<compile_context>
chip_gen: v7x
topology: tpu7x:2x2x1
jax: 0.10.0
libtpu: 0.0.40
codegen_flags: <defaults>
</compile_context>

<pallas_src>
import jax
import jax.numpy as jnp
from jax.experimental import pallas as pl
from jax.experimental.pallas import tpu as pltpu

HIDDEN = 1024


def linreg_kernel(x_ref, w1_ref, b1_ref, w2_ref, b2_ref, out_ref):
    w2 = w2_ref[...]                                          # (1, H)
    # Exact affine fold of the two Linear layers (no nonlinearity between
    # them):  w_eff[a] = sum_h W1[a,h] * w2[h],  b_eff = sum_h b1[h] * w2[h].
    w_eff = jnp.sum(w1_ref[...] * w2, axis=-1)                # (A,)
    b_eff = jnp.sum(b1_ref[...] * w2, axis=-1, keepdims=True)  # (1, 1)
    # Per-row multiply + lane reduce over the small attribute axis (VPU/XLU).
    y = jnp.sum(x_ref[...] * w_eff[None, :], axis=-1)         # (bm,)
    # Lane-dense store: bm sits on the lane axis of the (1, bm) output block.
    out2d = y[None, :] + b_eff + b2_ref[0, 0]                 # b2: SMEM scalar
    out_ref[...] = out2d.astype(out_ref.dtype)


def _round_up(n, m):
    return ((n + m - 1) // m) * m


def _vmem_limit_bytes():
    # 64 MiB on 128-MiB parts (v5e/v6e); cap // 2 = 32 MiB on v7x (64 MiB/TC).
    try:
        cap = pltpu.get_tpu_info().vmem_capacity_bytes
    except Exception:
        cap = 64 << 20
    return min(cap // 2, 64 << 20)


def linear_regressor_forward(x, params, *, bm=1024):
    """out = (x @ W1 + b1) @ w2^T + b2, squeezed — one fused Pallas kernel."""
    w1, b1, w2, b2 = params            # (A,H), (1,H), (1,H), (1,1)
    B, A = x.shape

    # Adaptive batch tile: multiple of 128 (unmasked lane-dense stores), no
    # larger than the padded batch, and >= 2 tiles whenever the batch allows
    # it so both v7x TensorCores get work.
    bm = max(128, min(bm, _round_up(B, 128)))
    if _round_up(B, 128) >= 256 and pl.cdiv(B, bm) < 2:
        bm = _round_up(pl.cdiv(_round_up(B, 128), 2), 128)

    n_tiles = pl.cdiv(B, bm)
    B_pad = n_tiles * bm
    if B_pad != B:                     # zero-pad batch to full tiles
        x = jnp.pad(x, ((0, B_pad - B), (0, 0)))

    const = lambda i: (0, 0)           # params resident across all batch tiles
    in_specs = [
        pl.BlockSpec((bm, A), lambda i: (i, 0)),
        pl.BlockSpec(w1.shape, const),
        pl.BlockSpec(b1.shape, const),
        pl.BlockSpec(w2.shape, const),
        pl.BlockSpec(memory_space=pltpu.MemorySpace.SMEM),    # scalar bias b2
    ]
    out_specs = pl.BlockSpec((1, bm), lambda i: (0, i))       # lane-dense slab

    out = pl.pallas_call(
        linreg_kernel,
        out_shape=jax.ShapeDtypeStruct((1, B_pad), jnp.float32),
        grid_spec=pltpu.PrefetchScalarGridSpec(
            num_scalar_prefetch=0,
            grid=(n_tiles,),
            in_specs=in_specs,
            out_specs=out_specs,
        ),
        compiler_params=pltpu.CompilerParams(
            dimension_semantics=("parallel",),
            vmem_limit_bytes=_vmem_limit_bytes(),
        ),
    )(x, w1, b1, w2, b2)

    return jnp.squeeze(out[0, :B])     # matches PyTorch's x.squeeze()


def init_params(key, attributes, hidden=HIDDEN):
    """Mirror the PyTorch module's init:
       - weights: xavier_uniform_
       - biases : nn.Linear default U(-1/sqrt(fan_in), 1/sqrt(fan_in))
       Weights are stored as (in, out) so the kernel computes x @ W."""
    k1w, k1b, k2w, k2b = jax.random.split(key, 4)
    lim1 = jnp.sqrt(6.0 / (attributes + hidden))
    w1 = jax.random.uniform(k1w, (attributes, hidden), jnp.float32, -lim1, lim1)
    blim1 = 1.0 / jnp.sqrt(attributes)
    b1 = jax.random.uniform(k1b, (1, hidden), jnp.float32, -blim1, blim1)
    lim2 = jnp.sqrt(6.0 / (hidden + 1))
    w2 = jax.random.uniform(k2w, (1, hidden), jnp.float32, -lim2, lim2)
    blim2 = 1.0 / jnp.sqrt(hidden)
    b2 = jax.random.uniform(k2b, (1, 1), jnp.float32, -blim2, blim2)
    return w1, b1, w2, b2


def linear_regressor_reference(x, params):
    w1, b1, w2, b2 = params
    h = jnp.dot(x, w1, precision=jax.lax.Precision.HIGHEST) + b1
    y = jnp.dot(h, w2.T, precision=jax.lax.Precision.HIGHEST) + b2
    return jnp.squeeze(y)


if __name__ == "__main__":
    key = jax.random.PRNGKey(0)
    key, kx = jax.random.split(key)

    batch, attributes = 8, 32
    x = jax.random.normal(kx, (batch, attributes), jnp.float32)
    params = init_params(key, attributes)

    out = linear_regressor_forward(x, params)
    out = jax.block_until_ready(out)

    ref = linear_regressor_reference(x, params)
    assert out.shape == (batch,)
    assert jnp.allclose(out, ref, atol=1e-4, rtol=1e-4), float(
        jnp.max(jnp.abs(out - ref)))

    print("KERNEL_OK")
</pallas_src>

<mosaic_0001>
module attributes {stable_mosaic.version = 11 : i64} {
  func.func @linreg_kernel(%arg0: i32, %arg1: memref<128x32xf32, #tpu.memory_space<vmem>>, %arg2: memref<32x1024xf32, #tpu.memory_space<vmem>>, %arg3: memref<1x1024xf32, #tpu.memory_space<vmem>>, %arg4: memref<1x1024xf32, #tpu.memory_space<vmem>>, %arg5: memref<1x1xf32, #tpu.memory_space<smem>>, %arg6: memref<1x128xf32, #tpu.memory_space<vmem>>) attributes {dimension_semantics = [#tpu.dimension_semantics<parallel>], iteration_bounds = array<i64: 1>, scalar_prefetch = 0 : i64, scratch_operands = 0 : i64, tpu.core_type = #tpu.core_type<tc>, window_params = [{transform_indices = @transform_0, window_bounds = array<i64: 128, 32>}, {pipeline_mode = #tpu.pipeline_mode<synchronous>, transform_indices = @transform_1, window_bounds = array<i64: 32, 1024>}, {pipeline_mode = #tpu.pipeline_mode<synchronous>, transform_indices = @transform_2, window_bounds = array<i64: 1, 1024>}, {pipeline_mode = #tpu.pipeline_mode<synchronous>, transform_indices = @transform_3, window_bounds = array<i64: 1, 1024>}, {transform_indices = @transform_4, window_bounds = array<i64: 1, 1>}, {transform_indices = @transform_5, window_bounds = array<i64: 1, 128>}]} {
    %c0 = arith.constant 0 : index
    %c0_0 = arith.constant 0 : index
    %0 = vector.load %arg4[%c0, %c0_0] : memref<1x1024xf32, #tpu.memory_space<vmem>>, vector<1x1024xf32>
    %c0_1 = arith.constant 0 : index
    %c0_2 = arith.constant 0 : index
    %1 = vector.load %arg2[%c0_1, %c0_2] : memref<32x1024xf32, #tpu.memory_space<vmem>>, vector<32x1024xf32>
    %2 = vector.broadcast %0 : vector<1x1024xf32> to vector<32x1024xf32>
    %3 = arith.mulf %1, %2 : vector<32x1024xf32>
    %cst = arith.constant dense<0.000000e+00> : vector<32xf32>
    %4 = vector.multi_reduction <add>, %3, %cst [1] : vector<32x1024xf32> to vector<32xf32>
    %c0_3 = arith.constant 0 : index
    %c0_4 = arith.constant 0 : index
    %5 = vector.load %arg3[%c0_3, %c0_4] : memref<1x1024xf32, #tpu.memory_space<vmem>>, vector<1x1024xf32>
    %6 = arith.mulf %5, %0 : vector<1x1024xf32>
    %cst_5 = arith.constant dense<0.000000e+00> : vector<1xf32>
    %7 = vector.multi_reduction <add>, %6, %cst_5 [1] : vector<1x1024xf32> to vector<1xf32>
    %8 = vector.shape_cast %7 : vector<1xf32> to vector<1x1xf32>
    %c0_6 = arith.constant 0 : index
    %c0_7 = arith.constant 0 : index
    %9 = vector.load %arg1[%c0_6, %c0_7] : memref<128x32xf32, #tpu.memory_space<vmem>>, vector<128x32xf32>
    %10 = vector.shape_cast %4 : vector<32xf32> to vector<1x32xf32>
    %11 = vector.broadcast %10 : vector<1x32xf32> to vector<128x32xf32>
    %12 = arith.mulf %9, %11 : vector<128x32xf32>
    %cst_8 = arith.constant dense<0.000000e+00> : vector<128xf32>
    %13 = vector.multi_reduction <add>, %12, %cst_8 [1] : vector<128x32xf32> to vector<128xf32>
    %14 = vector.shape_cast %13 : vector<128xf32> to vector<1x128xf32>
    %15 = vector.broadcast %8 : vector<1x1xf32> to vector<1x128xf32>
    %16 = arith.addf %14, %15 : vector<1x128xf32>
    %c0_9 = arith.constant 0 : index
    %c0_10 = arith.constant 0 : index
    %17 = memref.load %arg5[%c0_9, %c0_10] : memref<1x1xf32, #tpu.memory_space<smem>>
    %18 = vector.broadcast %17 : f32 to vector<1x128xf32>
    %19 = arith.addf %16, %18 : vector<1x128xf32>
    %c0_11 = arith.constant 0 : index
    %c0_12 = arith.constant 0 : index
    %20 = vector.load %arg6[%c0_11, %c0_12] : memref<1x128xf32, #tpu.memory_space<vmem>>, vector<1x128xf32>
    tpu.vector_store %arg6[%c0_11, %c0_12], %19 {strides = array<i32>} : memref<1x128xf32, #tpu.memory_space<vmem>>, vector<1x128xf32>,
    return
  }
  func.func @transform_0(%arg0: i32) -> (i32, i32) {
    %c0_i32 = arith.constant 0 : i32
    %c0_i32_0 = arith.constant 0 : i32
    return %arg0, %c0_i32 : i32, i32
  }
  func.func @transform_1(%arg0: i32) -> (i32, i32) {
    %c0_i32 = arith.constant 0 : i32
    %c0_i32_0 = arith.constant 0 : i32
    %c0_i32_1 = arith.constant 0 : i32
    return %c0_i32, %c0_i32_0 : i32, i32
  }
  func.func @transform_2(%arg0: i32) -> (i32, i32) {
    %c0_i32 = arith.constant 0 : i32
    %c0_i32_0 = arith.constant 0 : i32
    %c0_i32_1 = arith.constant 0 : i32
    return %c0_i32, %c0_i32_0 : i32, i32
  }
  func.func @transform_3(%arg0: i32) -> (i32, i32) {
    %c0_i32 = arith.constant 0 : i32
    %c0_i32_0 = arith.constant 0 : i32
    %c0_i32_1 = arith.constant 0 : i32
    return %c0_i32, %c0_i32_0 : i32, i32
  }
  func.func @transform_4(%arg0: i32) -> (i32, i32) {
    %c0_i32 = arith.constant 0 : i32
    %c0_i32_0 = arith.constant 0 : i32
    %c0_i32_1 = arith.constant 0 : i32
    return %c0_i32, %c0_i32_0 : i32, i32
  }
  func.func @transform_5(%arg0: i32) -> (i32, i32) {
    %c0_i32 = arith.constant 0 : i32
    %c0_i32_0 = arith.constant 0 : i32
    return %c0_i32, %arg0 : i32, i32
  }
}

</mosaic_0001>

<bundles_post_ra>
// kernel: tpu_custom_call.1
= control target key start
LH: loop header
LB: loop body
LE: loop exit
PB: predicated region body
PF: predicated region fallthrough
CT: control target
= control target key end

     0   :  { %11 = vsyncpa [#allocation4], 0  ;;  %s937_s0 = inlined_call_operand.vmem [shape: f32[128,32], index: 0, kind: input, shape index: {}]   ;;  %s938_s1 = inlined_call_operand.hbm [shape: f32[32,1024], index: 1, kind: input, shape index: {}]   ;;  %s939_s2 = inlined_call_operand.vmem [shape: f32[1,1024], index: 2, kind: input, shape index: {}]   ;;  %s940_s3 = inlined_call_operand.vmem [shape: f32[1,1024], index: 3, kind: input, shape index: {}]   ;;  %s941_s4 = inlined_call_operand.<no memory space> [shape: f32[1,1], index: 4, kind: input, shape index: {}]   ;;  %s942_s5 = inlined_call_operand.hbm [shape: f32[1,128], index: 5, kind: output, shape index: {}]  }
   0x1   :  { %12 = vsyncpa [#allocation5], 0  ;;  %s643_s18 = smov [#allocation3]   ;;  %s595_s22 = scalar_lea.hbm %s938_s1, 4096 }
   0x2   :  { %s20_s19 = sshll.u32 %s643_s18, 4  ;;  %p596_p0 = scmp.ne.s32.totalorder %s938_s1, %s595_s22  ;;  %s21_s19 = int_to_ptr.vmem [resolvable:$true] %s20_s19 }
   0x3   :  { %p599_p1 = scmp.lt.u32.totalorder %s595_s22, %s938_s1 }
   0x5   :  { %p601_p2 = pnand %p599_p1, %p596_p0 }
   0x7   :  { %604 = shalt.err (!%p601_p2)
}
   0x8   :  { %s605_s27 = scalar_lea.vmem %s21_s19, 4096  ;;  %p610_p4 = scmp.lt.s32.totalorder %s21_s19, %s21_s19 }
   0x9   :  { %p606_p3 = scmp.ne.s32.totalorder %s21_s19, %s605_s27  ;;  %p611_p5 = scmp.lt.s32.totalorder %s605_s27, %s605_s27 }
   0xb   :  { %p612_p6 = por %p611_p5, %p610_p4 }
   0xd   :  { %p613_p7 = pnand %p612_p6, %p606_p3 }
   0xf   :  { %616 = shalt.err (!%p613_p7)
}
  0x10   :  { %s644_s28 = smov 1024   ;;  %s645_s29 = smov 64  }
  0x11   :  { %26 = dma.hbm_to_vmem [thread:$0]  %s938_s1, 4096, %s21_s19, [#allocation4], %s644_s28, %s644_s28, %s645_s29  }
  0x12   :  { %639 = dma.done.wait [#allocation4], 4096  }
  0x13   :  { %640 = vsyncadd [#allocation4], 4294963200  ;;  %v70_v0 = vlaneseq  ;;  %v703_v7 = vld [vmem:[%s940_s3] sm:$0xff]  ;;  %v38_v9 = vld [vmem:[#allocation3 + $0x8] sm:$0xff]  ;;  %vm221_vm0 = vcmask 1040384   ;;  %vm270_vm1 = vcmask 130112  }
  0x14   :  { %v37_v8 = vld [vmem:[#allocation3] sm:$0xff]  ;;  %v39_v12 = vld [vmem:[#allocation3 + $0x10] sm:$0xff]  ;;  %v40_v13 = vld [vmem:[#allocation3 + $0x18] sm:$0xff]  ;;  %vm277_vm2 = vcmask 195712   ;;  %vm284_vm3 = vcmask 261312   ;;  %vm315_vm4 = vcmask 261120  }
  0x15   :  { %v691_v1 = vshrl.u32 %v70_v0, 7  ;;  %v41_v18 = vld [vmem:[#allocation3 + $0x20] sm:$0xff]  ;;  %v54_v24 = vld [vmem:[#allocation3 + $0x88] sm:$0xff]  ;;  %v55_v25 = vld [vmem:[#allocation3 + $0x90] sm:$0xff]  ;;  %vm492_vm5 = vcmask 326912   ;;  %vm499_vm6 = vcmask 392512  }
  0x16   :  { %v53_v23 = vld [vmem:[#allocation3 + $0x80] sm:$0xff]  ;;  %v56_v30 = vld [vmem:[#allocation3 + $0x98] sm:$0xff]  ;;  %v42_v31 = vld [vmem:[#allocation3 + $0x28] sm:$0xff]  ;;  %vm506_vm7 = vcmask 458112   ;;  %vm513_vm8 = vcmask 523712   ;;  %vm520_vm9 = vcmask 589312  }
  0x17   :  { %v694_v2 = vsub.s32 0, %v691_v1  ;;  %v76_v3 = vsub.s32 1, %v691_v1  ;;  %v80_v4 = vsub.s32 2, %v691_v1  ;;  %v84_v5 = vsub.s32 3, %v691_v1  ;;  %v43_v32 = vld [vmem:[#allocation3 + $0x30] sm:$0xff]  ;;  %v45_v37 = vld [vmem:[#allocation3 + $0x40] sm:$0xff] }
  0x18   :  { %v88_v6 = vsub.s32 4, %v691_v1  ;;  %v92_v10 = vsub.s32 5, %v691_v1  ;;  %v96_v11 = vsub.s32 6, %v691_v1  ;;  %v100_v28 = vsub.s32 7, %v691_v1  ;;  %v57_v39 = vld [vmem:[#allocation3 + $0xa0] sm:$0xff]  ;;  %v46_v40 = vld [vmem:[#allocation3 + $0x48] sm:$0xff] }
  0x19   :  { %v73_v14 = vrot.slane %v703_v7, %v694_v2  ;;  %v77_v15 = vrot.slane %v703_v7, %v76_v3  ;;  %v81_v16 = vrot.slane %v703_v7, %v80_v4  ;;  %v718_v17 = vrot.slane %v703_v7, %v84_v5  ;;  %v47_v41 = vld [vmem:[#allocation3 + $0x50] sm:$0xff]  ;;  %v44_v42 = vld [vmem:[#allocation3 + $0x38] sm:$0xff]  ;;  %v58_v50 = vld [vmem:[#allocation3 + $0xa8] sm:$0xff] }
  0x1a   :  { %v723_v19 = vrot.slane %v703_v7, %v88_v6  ;;  %v728_v26 = vrot.slane %v703_v7, %v92_v10  ;;  %v733_v27 = vrot.slane %v703_v7, %v96_v11  ;;  %v48_v46 = vld [vmem:[#allocation3 + $0x58] sm:$0xff]  ;;  %v101_v48 = vrot.slane %v703_v7, %v100_v28  ;;  %v61_v53 = vld [vmem:[#allocation3 + $0xc0] sm:$0xff]  ;;  %v62_v54 = vld [vmem:[#allocation3 + $0xc8] sm:$0xff] }
  0x1b   :  { %v110_v20 = vmul.f32 %v73_v14, %v37_v8  ;;  %v111_v21 = vmul.f32 %v77_v15, %v38_v9  ;;  %v112_v22 = vmul.f32 %v81_v16, %v39_v12  ;;  %v113_v29 = vmul.f32 %v718_v17, %v40_v13  ;;  %v59_v57 = vld [vmem:[#allocation3 + $0xb0] sm:$0xff]  ;;  %v49_v60 = vld [vmem:[#allocation3 + $0x60] sm:$0xff]  ;;  %v64_v8 = vld [vmem:[#allocation3 + $0xd8] sm:$0xff] }
  0x1c   :  { %v126_v34 = vmul.f32 %v73_v14, %v53_v23  ;;  %v127_v35 = vmul.f32 %v77_v15, %v54_v24  ;;  %v128_v36 = vmul.f32 %v81_v16, %v55_v25  ;;  %v114_v38 = vmul.f32 %v723_v19, %v41_v18  ;;  %v63_v61 = vld [vmem:[#allocation3 + $0xd0] sm:$0xff]  ;;  %v60_v18 = vld [vmem:[#allocation3 + $0xb8] sm:$0xff] }
  0x1d   :  { %v142_v33 = vadd.f32 %v111_v21, %v110_v20  ;;  %v129_v44 = vmul.f32 %v718_v17, %v56_v30  ;;  %v118_v47 = vmul.f32 %v73_v14, %v45_v37  ;;  %v115_v49 = vmul.f32 %v728_v26, %v42_v31  ;;  %v65_v31 = vld [vmem:[#allocation3 + $0xe0] sm:$0xff] }
  0x1e   :  { %v160_v45 = vadd.f32 %v127_v35, %v126_v34  ;;  %v119_v51 = vmul.f32 %v77_v15, %v46_v40  ;;  %v120_v52 = vmul.f32 %v81_v16, %v47_v41  ;;  %v116_v55 = vmul.f32 %v733_v27, %v43_v32  ;;  %v51_v34 = vld [vmem:[#allocation3 + $0x70] sm:$0xff]  ;;  %v52_v40 = vld [vmem:[#allocation3 + $0x78] sm:$0xff] }
  0x1f   :  { %v143_v43 = vadd.f32 %v142_v33, %v112_v22  ;;  %v130_v58 = vmul.f32 %v723_v19, %v57_v39  ;;  %v121_v62 = vmul.f32 %v718_v17, %v48_v46  ;;  %v134_v9 = vmul.f32 %v73_v14, %v61_v53  ;;  %v50_v22 = vld [vmem:[#allocation3 + $0x68] sm:$0xff] }
  0x20   :  { %v161_v59 = vadd.f32 %v160_v45, %v128_v36  ;;  %v151_v63 = vadd.f32 %v119_v51, %v118_v47  ;;  %v135_v12 = vmul.f32 %v77_v15, %v62_v54  ;;  %v131_v20 = vmul.f32 %v728_v26, %v58_v50  ;;  %v67_v45 = vld [vmem:[#allocation3 + $0xf0] sm:$0xff] }
  0x21   :  { %v144_v56 = vadd.f32 %v143_v43, %v113_v29  ;;  %v136_v23 = vmul.f32 %v81_v16, %v63_v61  ;;  %v117_v24 = vmul.f32 %v101_v48, %v44_v42  ;;  %v132_v25 = vmul.f32 %v733_v27, %v59_v57 }
  0x22   :  { %v162_v21 = vadd.f32 %v161_v59, %v129_v44  ;;  %v122_v29 = vmul.f32 %v723_v19, %v49_v60  ;;  %v152_v30 = vadd.f32 %v151_v63, %v120_v52  ;;  %v137_v14 = vmul.f32 %v718_v17, %v64_v8  ;;  %v68_v52 = vld [vmem:[#allocation3 + $0xf8] sm:$0xff]  ;;  %v178_v60 = vld [vmem:[%s939_s2] sm:$0xff] }
  0x23   :  { %v145_v13 = vadd.f32 %v144_v56, %v114_v38  ;;  %v169_v15 = vadd.f32 %v135_v12, %v134_v9  ;;  %v133_v35 = vmul.f32 %v101_v48, %v60_v18  ;;  %v123_v36 = vmul.f32 %v728_v26, %v50_v22  ;;  %v66_v38 = vld [vmem:[#allocation3 + $0xe8] sm:$0xff] }
  0x24   :  { %v163_v33 = vadd.f32 %v162_v21, %v130_v58  ;;  %v153_v37 = vadd.f32 %v152_v30, %v121_v62  ;;  %v138_v41 = vmul.f32 %v723_v19, %v65_v31  ;;  %v124_v43 = vmul.f32 %v733_v27, %v51_v34 }
  0x25   :  { %v146_v32 = vadd.f32 %v145_v13, %v115_v49  ;;  %v170_v42 = vadd.f32 %v169_v15, %v136_v23  ;;  %v139_v17 = vmul.f32 %v728_v26, %v66_v38  ;;  %v125_v50 = vmul.f32 %v101_v48, %v52_v40 }
  0x26   :  { %v164_v16 = vadd.f32 %v163_v33, %v131_v20  ;;  %v154_v44 = vadd.f32 %v153_v37, %v122_v29  ;;  %v140_v54 = vmul.f32 %v733_v27, %v67_v45  ;;  %v141_v19 = vmul.f32 %v101_v48, %v68_v52 }
  0x27   :  { %v147_v39 = vadd.f32 %v146_v32, %v116_v55  ;;  %v171_v49 = vadd.f32 %v170_v42, %v137_v14  ;;  %v179_v26 = vmul.f32 %v178_v60, %v703_v7  ;;  %v245_v60 = vld [vmem:[%s937_s0 + $0x30] sm:$0xff]  ;;  %vm527_vm10 = vcmask 654912  }
  0x28   :  { %v165_v47 = vadd.f32 %v164_v16, %v132_v25  ;;  %v155_v51 = vadd.f32 %v154_v44, %v123_v36  ;;  %v239_v44 = vld [vmem:[%s937_s0] sm:$0xff]  ;;  %vm534_vm11 = vcmask 720512   ;;  %vm541_vm12 = vcmask 786112  }
  0x29   :  { %v148_v46 = vadd.f32 %v147_v39, %v117_v24  ;;  %v172_v55 = vadd.f32 %v171_v49, %v138_v41  ;;  %v184_v62 = vrot.slane %v179_v26, %v694_v2  ;;  %v188_v27 = vrot.slane %v179_v26, %v76_v3 }
  0x2a   :  { %v166_v53 = vadd.f32 %v165_v47, %v133_v35  ;;  %v156_v56 = vadd.f32 %v155_v51, %v124_v43  ;;  %v192_v48 = vrot.slane %v179_v26, %v80_v4  ;;  %v196_v12 = vrot.slane %v179_v26, %v84_v5  ;;  %v240_v43 = vld [vmem:[%s937_s0 + $0x8] sm:$0xff]  ;;  %v241_v47 = vld [vmem:[%s937_s0 + $0x10] sm:$0xff] }
  0x2b   :  { %149 = vadd.xlane.f32.xlu0 %v148_v46  ;;  %v173_v57 = vadd.f32 %v172_v55, %v139_v17  ;;  %v222_v63 = vsel %vm221_vm0, %v184_v62, 0.0  ;;  %v223_v8 = vsel %vm221_vm0, %v188_v27, 0.0  ;;  %v200_v18 = vrot.slane %v179_v26, %v88_v6  ;;  %v242_v46 = vld [vmem:[%s937_s0 + $0x18] sm:$0xff]  ;;  %v243_v55 = vld [vmem:[%s937_s0 + $0x20] sm:$0xff] }
  0x2c   :  { %167 = vadd.xlane.f32.xlu1 %v166_v53  ;;  %v157_v58 = vadd.f32 %v156_v56, %v125_v50  ;;  %v224_v9 = vadd.f32 %v223_v8, %v222_v63  ;;  %v225_v7 = vsel %vm221_vm0, %v192_v48, 0.0  ;;  %v227_v3 = vsel %vm221_vm0, %v196_v12, 0.0  ;;  %v248_v48 = vld [vmem:[%s937_s0 + $0x48] sm:$0xff]  ;;  %v247_v63 = vld [vmem:[%s937_s0 + $0x40] sm:$0xff] }
  0x2d   :  { %v174_v59 = vadd.f32 %v173_v57, %v140_v54  ;;  %v204_v4 = vrot.slane %v179_v26, %v92_v10  ;;  %v229_v21 = vsel %vm221_vm0, %v200_v18, 0.0  ;;  %v208_v23 = vrot.slane %v179_v26, %v96_v11  ;;  %v244_v54 = vld [vmem:[%s937_s0 + $0x28] sm:$0xff]  ;;  %v249_v18 = vld [vmem:[%s937_s0 + $0x50] sm:$0xff] }
  0x2e   :  { %v226_v13 = vadd.f32 %v225_v7, %v224_v9  ;;  %v212_v25 = vrot.slane %v179_v26, %v100_v28  ;;  %v783_v10 = vand.u32 127, %v70_v0  ;;  %vm548_vm13 = vcmask 851712  }
  0x2f   :  { %158 = vadd.xlane.f32.xlu0 %v157_v58  ;;  %v175_v61 = vadd.f32 %v174_v59, %v141_v19  ;;  %v231_v5 = vsel %vm221_vm0, %v204_v4, 0.0  ;;  %v233_v6 = vsel %vm221_vm0, %v208_v23, 0.0  ;;  %v246_v59 = vld [vmem:[%s937_s0 + $0x38] sm:$0xff]  ;;  %v251_v23 = vld [vmem:[%s937_s0 + $0x60] sm:$0xff]  ;;  %vm555_vm14 = vcmask 917312  }
  0x30   :  { %v228_v20 = vadd.f32 %v227_v3, %v226_v13  ;;  %v235_v30 = vsel %vm221_vm0, %v212_v25, 0.0  ;;  %v265_v32 = vadd.s32 4294967288, %v783_v10  ;;  %v272_v11 = vadd.s32 4294967280, %v783_v10  ;;  %v250_v13 = vld [vmem:[%s937_s0 + $0x58] sm:$0xff] }
  0x31   :  { %176 = vadd.xlane.f32.xlu1 %v175_v61  ;;  %v279_v34 = vadd.s32 4294967272, %v783_v10  ;;  %v790_v28 = vsub.s32 %v783_v10, %v691_v1  ;;  %vm562_vm15 = vcmask 982912   ;;  %vm569_vm0 = vcmask 1048512  }
  0x32   :  { %v230_v22 = vadd.f32 %v229_v21, %v228_v20  ;;  %v793_v15 = vsub.s32 %v265_v32, %v691_v1  ;;  %v796_v35 = vsub.s32 %v272_v11, %v691_v1 }
  0x33   :  { %v799_v36 = vsub.s32 %v279_v34, %v691_v1 }
  0x34   :  { %v232_v24 = vadd.f32 %v231_v5, %v230_v22  ;;  %v252_v22 = vld [vmem:[%s937_s0 + $0x68] sm:$0xff]  ;;  %v646_v5 = vmov 0  }
  0x35   :  { %594 = vset.pattern.permute.xlu0 %v646_v5  ;;  %593 = vset.pattern.permute.xlu1 %v646_v5 }
  0x36   :  { %v234_v29 = vadd.f32 %v233_v6, %v232_v24 }
  0x38   :  { %v236_v31 = vadd.f32 %v235_v30, %v234_v29  ;;  %v254_v30 = vld [vmem:[%s937_s0 + $0x78] sm:$0xff] }
  0x3a   :  { %237 = vadd.xlane.f32.xlu0 %v236_v31  ;;  %v253_v31 = vld [vmem:[%s937_s0 + $0x70] sm:$0xff]  ;;  %s647_s0 = smov [#allocation6]  }
  0xb8   :  { %v150_v33 = vpop.xlane.xlu0 %149 }
  0xb9   :  { %v168_v14 = vpop.xlane.xlu1 %167  ;;  %v264_v37 = vrot.slane %v150_v33, %v790_v28 }
  0xba   :  { %v276_v39 = vrot.slane %v168_v14, %v796_v35 }
  0xbc   :  { %v159_v0 = vpop.xlane.xlu0 %158 }
  0xbd   :  { %v269_v38 = vrot.slane %v159_v0, %v793_v15 }
  0xbe   :  { %v177_v40 = vpop.xlane.xlu1 %176 }
  0xbf   :  { %v271_v16 = vsel %vm270_vm1, %v269_v38, %v264_v37  ;;  %v283_v42 = vrot.slane %v177_v40, %v799_v36 }
  0xc0   :  { %v278_v41 = vsel %vm277_vm2, %v276_v39, %v271_v16  ;;  %v876_v39 = vstv %s941_s4  ;;  %s579_s4 = sshll.u32 %s647_s0, 4  ;;  %s580_s4 = int_to_ptr.vmem [resolvable:$true] %s579_s4 }
  0xc1   :  { %v285_v45 = vsel %vm284_vm3, %v283_v42, %v278_v41  ;;  %s617_s14 = scalar_lea.vmem %s580_s4, 16  ;;  %s621_s15 = scalar_lea.vmem %s580_s4, 32 }
  0xc2   :  { %v300_v17 = vmul.f32 %v285_v45, %v240_v43  ;;  %v299_v49 = vmul.f32 %v285_v45, %v239_v44  ;;  %v302_v52 = vmul.f32 %v285_v45, %v242_v46  ;;  %v301_v53 = vmul.f32 %v285_v45, %v241_v47  ;;  %p618_p8 = scmp.ne.s32.totalorder %s580_s4, %s617_s14  ;;  %p622_p9 = scmp.lt.s32.totalorder %s580_s4, %s580_s4 }
  0xc3   :  { %v304_v57 = vmul.f32 %v285_v45, %v244_v54  ;;  %v303_v58 = vmul.f32 %v285_v45, %v243_v55  ;;  %v306_v62 = vmul.f32 %v285_v45, %v246_v59  ;;  %v305_v27 = vmul.f32 %v285_v45, %v245_v60  ;;  %p623_p10 = scmp.lt.s32.totalorder %s621_s15, %s617_s14 }
  0xc4   :  { %v319_v50 = vsel %vm315_vm4, %v300_v17, 0.0  ;;  %v316_v51 = vsel %vm315_vm4, %v299_v49, 0.0  ;;  %v325_v56 = vsel %vm315_vm4, %v302_v52, 0.0  ;;  %v322_v19 = vsel %vm315_vm4, %v301_v53, 0.0 }
  0xc5   :  { %320 = vadd.xlane.f32.xlu0 %v319_v50  ;;  %317 = vadd.xlane.f32.xlu1 %v316_v51  ;;  %v331_v26 = vsel %vm315_vm4, %v304_v57, 0.0  ;;  %v328_v61 = vsel %vm315_vm4, %v303_v58, 0.0  ;;  %v337_v8 = vsel %vm315_vm4, %v306_v62, 0.0  ;;  %v334_v9 = vsel %vm315_vm4, %v305_v27, 0.0  ;;  %p624_p11 = por %p623_p10, %p622_p9 }
  0xc6   :  { %v308_v12 = vmul.f32 %v285_v45, %v248_v48  ;;  %v307_v7 = vmul.f32 %v285_v45, %v247_v63  ;;  %v310_v4 = vmul.f32 %v285_v45, %v250_v13  ;;  %v309_v21 = vmul.f32 %v285_v45, %v249_v18 }
  0xc7   :  { %v312_v6 = vmul.f32 %v285_v45, %v252_v22  ;;  %v311_v29 = vmul.f32 %v285_v45, %v251_v23  ;;  %v314_v33 = vmul.f32 %v285_v45, %v254_v30  ;;  %v313_v34 = vmul.f32 %v285_v45, %v253_v31  ;;  %v238_v37 = vpop.xlane.xlu0 %237  ;;  %p625_p12 = pnand %p624_p11, %p618_p8 }
  0xc8   :  { %v343_v3 = vsel %vm315_vm4, %v308_v12, 0.0  ;;  %v340_v20 = vsel %vm315_vm4, %v307_v7, 0.0  ;;  %v349_v24 = vsel %vm315_vm4, %v310_v4, 0.0  ;;  %v346_v25 = vsel %vm315_vm4, %v309_v21, 0.0 }
  0xc9   :  { %326 = vadd.xlane.f32.xlu0 %v325_v56  ;;  %323 = vadd.xlane.f32.xlu1 %v322_v19  ;;  %v355_v32 = vsel %vm315_vm4, %v312_v6, 0.0  ;;  %v352_v11 = vsel %vm315_vm4, %v311_v29, 0.0  ;;  %v361_v14 = vsel %vm315_vm4, %v314_v33, 0.0  ;;  %v358_v0 = vsel %vm315_vm4, %v313_v34, 0.0 }
  0xca   :  { %v368_v38 = vrot.slane %v238_v37, %v694_v2 }
  0xcd   :  { %332 = vadd.xlane.f32.xlu0 %v331_v26  ;;  %329 = vadd.xlane.f32.xlu1 %v328_v61 }
  0xd1   :  { %338 = vadd.xlane.f32.xlu0 %v337_v8  ;;  %335 = vadd.xlane.f32.xlu1 %v334_v9 }
  0xd5   :  { %344 = vadd.xlane.f32.xlu0 %v343_v3  ;;  %341 = vadd.xlane.f32.xlu1 %v340_v20 }
  0xd9   :  { %350 = vadd.xlane.f32.xlu0 %v349_v24  ;;  %347 = vadd.xlane.f32.xlu1 %v346_v25 }
  0xdd   :  { %356 = vadd.xlane.f32.xlu0 %v355_v32  ;;  %353 = vadd.xlane.f32.xlu1 %v352_v11 }
  0xe1   :  { %362 = vadd.xlane.f32.xlu0 %v361_v14  ;;  %359 = vadd.xlane.f32.xlu1 %v358_v0  ;;  %v487_v14 = vadd.s32 4294967264, %v783_v10  ;;  %v494_v0 = vadd.s32 4294967256, %v783_v10 }
 0x152   :  { %v318_v16 = vpop.xlane.xlu1 %317  ;;  %v321_v40 = vpop.xlane.xlu0 %320 }
 0x153   :  { %v370_v41 = vadd.f32 %v368_v38, %v318_v16  ;;  %v371_v42 = vadd.f32 %v368_v38, %v321_v40  ;;  %v501_v16 = vadd.s32 4294967248, %v783_v10 }
 0x155   :  { %v388_v43 = vadd.f32 %v876_v39, %v370_v41  ;;  %v389_v44 = vadd.f32 %v876_v39, %v371_v42  ;;  %v508_v41 = vadd.s32 4294967240, %v783_v10 }
 0x156   :  { %v324_v45 = vpop.xlane.xlu1 %323  ;;  %v327_v46 = vpop.xlane.xlu0 %326 }
 0x157   :  { %v372_v47 = vadd.f32 %v368_v38, %v324_v45  ;;  %421 = vperm.xlu1 %593, %v388_v43   ;;  %424 = vperm.xlu0 %594, %v389_v44   ;;  %v373_v17 = vadd.f32 %v368_v38, %v327_v46  ;;  %v497_v44 = vsub.s32 %v494_v0, %v691_v1 }
 0x158   :  { %v504_v46 = vsub.s32 %v501_v16, %v691_v1 }
 0x159   :  { %v390_v2 = vadd.f32 %v876_v39, %v372_v47  ;;  %v391_v51 = vadd.f32 %v876_v39, %v373_v17  ;;  %v511_v17 = vsub.s32 %v508_v41, %v691_v1 }
 0x15a   :  { %v330_v49 = vpop.xlane.xlu1 %329  ;;  %v333_v50 = vpop.xlane.xlu0 %332 }
 0x15b   :  { %427 = vperm.xlu1 %593, %v390_v2   ;;  %v374_v52 = vadd.f32 %v368_v38, %v330_v49  ;;  %v375_v55 = vadd.f32 %v368_v38, %v333_v50  ;;  %v522_v49 = vadd.s32 4294967224, %v783_v10 }
 0x15d   :  { %v392_v54 = vadd.f32 %v876_v39, %v374_v52  ;;  %v393_v57 = vadd.f32 %v876_v39, %v375_v55 }
 0x15e   :  { %v336_v53 = vpop.xlane.xlu1 %335  ;;  %v339_v56 = vpop.xlane.xlu0 %338 }
 0x15f   :  { %430 = vperm.xlu1 %593, %v391_v51   ;;  %v376_v58 = vadd.f32 %v368_v38, %v336_v53  ;;  %v377_v62 = vadd.f32 %v368_v38, %v339_v56  ;;  %v529_v53 = vadd.s32 4294967216, %v783_v10 }
 0x161   :  { %v394_v61 = vadd.f32 %v876_v39, %v376_v58  ;;  %v395_v8 = vadd.f32 %v876_v39, %v377_v62  ;;  %v543_v62 = vadd.s32 4294967200, %v783_v10 }
 0x162   :  { %v342_v19 = vpop.xlane.xlu1 %341  ;;  %v345_v26 = vpop.xlane.xlu0 %344 }
 0x163   :  { %433 = vperm.xlu1 %593, %v392_v54   ;;  %v378_v9 = vadd.f32 %v368_v38, %v342_v19  ;;  %v379_v20 = vadd.f32 %v368_v38, %v345_v26  ;;  %v525_v19 = vsub.s32 %v522_v49, %v691_v1 }
 0x165   :  { %v396_v3 = vadd.f32 %v876_v39, %v378_v9  ;;  %v397_v22 = vadd.f32 %v876_v39, %v379_v20  ;;  %v550_v9 = vadd.s32 4294967192, %v783_v10  ;;  %v557_v20 = vadd.s32 4294967184, %v783_v10 }
 0x166   :  { %v348_v59 = vpop.xlane.xlu1 %347  ;;  %v351_v7 = vpop.xlane.xlu0 %350 }
 0x167   :  { %v380_v60 = vadd.f32 %v368_v38, %v348_v59  ;;  %436 = vperm.xlu1 %593, %v393_v57   ;;  %v381_v23 = vadd.f32 %v368_v38, %v351_v7  ;;  %v536_v57 = vadd.s32 4294967208, %v783_v10 }
 0x169   :  { %v398_v27 = vadd.f32 %v876_v39, %v380_v60  ;;  %v399_v5 = vadd.f32 %v876_v39, %v381_v23  ;;  %v564_v23 = vadd.s32 4294967176, %v783_v10 }
 0x16a   :  { %v354_v48 = vpop.xlane.xlu1 %353  ;;  %v357_v21 = vpop.xlane.xlu0 %356 }
 0x16b   :  { %v382_v63 = vadd.f32 %v368_v38, %v354_v48  ;;  %451 = vperm.xlu0 %594, %v398_v27   ;;  %439 = vperm.xlu1 %593, %v394_v61   ;;  %v383_v24 = vadd.f32 %v368_v38, %v357_v21  ;;  %v532_v61 = vsub.s32 %v529_v53, %v691_v1 }
 0x16d   :  { %v400_v12 = vadd.f32 %v876_v39, %v382_v63  ;;  %v401_v6 = vadd.f32 %v876_v39, %v383_v24 }
 0x16e   :  { %v360_v13 = vpop.xlane.xlu1 %359  ;;  %v363_v25 = vpop.xlane.xlu0 %362 }
 0x16f   :  { %v384_v18 = vadd.f32 %v368_v38, %v360_v13  ;;  %457 = vperm.xlu0 %594, %v400_v12   ;;  %442 = vperm.xlu1 %593, %v395_v8   ;;  %v385_v29 = vadd.f32 %v368_v38, %v363_v25  ;;  %v490_v38 = vsub.s32 %v487_v14, %v691_v1 }
 0x170   :  { %v539_v8 = vsub.s32 %v536_v57, %v691_v1 }
 0x171   :  { %v402_v4 = vadd.f32 %v876_v39, %v384_v18  ;;  %v403_v30 = vadd.f32 %v876_v39, %v385_v29  ;;  %v515_v39 = vadd.s32 4294967232, %v783_v10 }
 0x173   :  { %463 = vperm.xlu0 %594, %v402_v4   ;;  %445 = vperm.xlu1 %593, %v396_v3   ;;  %v518_v51 = vsub.s32 %v515_v39, %v691_v1  ;;  %v546_v3 = vsub.s32 %v543_v62, %v691_v1 }
 0x177   :  { %448 = vperm.xlu1 %593, %v397_v22   ;;  %v553_v22 = vsub.s32 %v550_v9, %v691_v1 }
 0x17b   :  { %454 = vperm.xlu1 %593, %v399_v5  }
 0x17f   :  { %460 = vperm.xlu1 %593, %v401_v6   ;;  %v560_v6 = vsub.s32 %v557_v20, %v691_v1 }
 0x183   :  { %466 = vperm.xlu1 %593, %v403_v30  }
 0x1d6   :  { %v422_v31 = vpop.permute.xlu1 %421  ;;  %v425_v37 = vpop.permute.xlu0 %424 }
 0x1d7   :  { %v471_v42 = vrot.slane %v422_v31, %v790_v28  ;;  %v475_v43 = vrot.slane %v425_v37, %v793_v15 }
 0x1d9   :  { %v476_v28 = vsel %vm270_vm1, %v475_v43, %v471_v42 }
 0x1da   :  { %v428_v32 = vpop.permute.xlu1 %427 }
 0x1db   :  { %v480_v45 = vrot.slane %v428_v32, %v796_v35  ;;  %v567_v32 = vsub.s32 %v564_v23, %v691_v1 }
 0x1dd   :  { %v481_v52 = vsel %vm277_vm2, %v480_v45, %v476_v28 }
 0x1de   :  { %v431_v11 = vpop.permute.xlu1 %430 }
 0x1df   :  { %v485_v2 = vrot.slane %v431_v11, %v799_v36 }
 0x1e1   :  { %v486_v36 = vsel %vm284_vm3, %v485_v2, %v481_v52 }
 0x1e2   :  { %v434_v33 = vpop.permute.xlu1 %433 }
 0x1e3   :  { %v491_v50 = vrot.slane %v434_v33, %v490_v38 }
 0x1e5   :  { %v493_v58 = vsel %vm492_vm5, %v491_v50, %v486_v36 }
 0x1e6   :  { %v437_v34 = vpop.permute.xlu1 %436 }
 0x1e7   :  { %v498_v15 = vrot.slane %v437_v34, %v497_v44 }
 0x1e9   :  { %v500_v60 = vsel %vm499_vm6, %v498_v15, %v493_v58 }
 0x1ea   :  { %v440_v40 = vpop.permute.xlu1 %439  ;;  %v452_v55 = vpop.permute.xlu0 %451 }
 0x1eb   :  { %v505_v35 = vrot.slane %v440_v40, %v504_v46  ;;  %v533_v18 = vrot.slane %v452_v55, %v532_v61 }
 0x1ed   :  { %v507_v26 = vsel %vm506_vm7, %v505_v35, %v500_v60 }
 0x1ee   :  { %v443_v47 = vpop.permute.xlu1 %442  ;;  %v458_v7 = vpop.permute.xlu0 %457 }
 0x1ef   :  { %v512_v56 = vrot.slane %v443_v47, %v511_v17  ;;  %v547_v25 = vrot.slane %v458_v7, %v546_v3 }
 0x1f1   :  { %v514_v48 = vsel %vm513_vm8, %v512_v56, %v507_v26 }
 0x1f2   :  { %v446_v54 = vpop.permute.xlu1 %445  ;;  %v464_v30 = vpop.permute.xlu0 %463 }
 0x1f3   :  { %v519_v59 = vrot.slane %v446_v54, %v518_v51  ;;  %v561_v34 = vrot.slane %v464_v30, %v560_v6 }
 0x1f5   :  { %v521_v12 = vsel %vm520_vm9, %v519_v59, %v514_v48 }
 0x1f6   :  { %v449_v27 = vpop.permute.xlu1 %448 }
 0x1f7   :  { %v526_v63 = vrot.slane %v449_v27, %v525_v19 }
 0x1f9   :  { %v528_v13 = vsel %vm527_vm10, %v526_v63, %v521_v12 }
 0x1fa   :  { %v455_v4 = vpop.permute.xlu1 %454  ;;  %v535_v5 = vsel %vm534_vm11, %v533_v18, %v528_v13 }
 0x1fb   :  { %v540_v21 = vrot.slane %v455_v4, %v539_v8 }
 0x1fd   :  { %v542_v24 = vsel %vm541_vm12, %v540_v21, %v535_v5 }
 0x1fe   :  { %v461_v29 = vpop.permute.xlu1 %460  ;;  %v549_v11 = vsel %vm548_vm13, %v547_v25, %v542_v24 }
 0x1ff   :  { %v554_v31 = vrot.slane %v461_v29, %v553_v22 }
 0x201   :  { %v556_v33 = vsel %vm555_vm14, %v554_v31, %v549_v11 }
 0x202   :  { %v467_v14 = vpop.permute.xlu1 %466  ;;  %v563_v0 = vsel %vm562_vm15, %v561_v34, %v556_v33 }
 0x203   :  { %v568_v10 = vrot.slane %v467_v14, %v567_v32 }
 0x205   :  { %v570_v37 = vsel %vm569_vm0, %v568_v10, %v563_v0 }
 0x206   :  { %572 = vst [vmem:[#allocation6] sm:$0x1] %v570_v37 }
 0x207   :  { %628 = shalt.err (!%p625_p12)
}
 0x208   :  { %s629_s18 = scalar_lea.hbm %s942_s5, 16 }
 0x209   :  { %p630_p13 = scmp.ne.s32.totalorder %s942_s5, %s629_s18  ;;  %p633_p0 = scmp.lt.u32.totalorder %s629_s18, %s942_s5 }
 0x20b   :  { %p635_p1 = pnand %p633_p0, %p630_p13 }
 0x20d   :  { %638 = shalt.err (!%p635_p1)
}
 0x20e   :  { %582 = dma.vmem_to_hbm [thread:$0]  %s580_s4, 16, %s942_s5, [#allocation5]  }
 0x20f   :  { %641 = dma.done.wait [#allocation5], 16  }
 0x210   :  { %642 = vsyncadd [#allocation5], 4294967280 }
 0x211   :  { %586 = vsyncpa [#allocation4], 1 }
 0x212   :  { %587 = vsyncpa [#allocation5], 1 }

</bundles_post_ra>
